<compile_context>
chip_gen: v6e
topology: v6e:2x2x1
jax: 0.10.0
libtpu: 0.0.40
codegen_flags: <defaults>
</compile_context>

<pallas_src>
import functools

import jax
import jax.numpy as jnp
from jax.experimental import pallas as pl
from jax.experimental.pallas import tpu as pltpu


def _intepe_kernel(coords_ref, expvar_ref, out_ref, *, num_deg: int, min_deg: int):
    """One lane-tile of the IntePE_MixDim forward (lane-dense layout).

    coords_ref: [dim, TILE]         (VMEM)  coords, transposed, N on lanes
    expvar_ref: [num_deg, 1]        (VMEM)  exp(-0.5 * scales * sum(covar))
    out_ref:    [2*num_deg, TILE]   (VMEM)  rows 0..num_deg-1 = sin, rest = cos
    """
    c = coords_ref[...]                                   # [dim, TILE]
    s = jnp.sum(c, axis=0, keepdims=True)                 # [1, TILE]  (mix dims)

    # scales = arange(min_deg, max_deg), baked as a compile-time iota constant.
    deg = (jax.lax.broadcasted_iota(jnp.int32, (num_deg, 1), 0)
           .astype(jnp.float32) + float(min_deg))         # [num_deg, 1]

    encd = deg * s                                        # [num_deg, TILE]
    ev = expvar_ref[...]                                  # [num_deg, 1] (lane bcast)

    # Two slice stores instead of a concatenate (no extra VMEM copy).
    out_ref[0:num_deg, :] = jnp.sin(encd) * ev
    out_ref[num_deg:2 * num_deg, :] = jnp.cos(encd) * ev


def intepe_mixdim_forward(coords: jax.Array, covar: jax.Array,
                          min_deg: int, max_deg: int,
                          *, tile_lanes: int = 65536) -> jax.Array:
    """coords: [..., dim], covar: [dim] -> [..., 2*(max_deg-min_deg)]."""
    num_deg = max_deg - min_deg
    dim = coords.shape[-1]
    lead_shape = coords.shape[:-1]
    out_dim = 2 * num_deg

    coords2d = coords.reshape(-1, dim).astype(jnp.float32)      # [N, dim]
    n = coords2d.shape[0]

    # exp_covar = exp(-0.5 * scales * sum(covar))  (runtime covar, tiny input).
    scales = jnp.arange(min_deg, max_deg, dtype=jnp.float32)     # [num_deg]
    exp_covar = jnp.exp(-0.5 * scales * jnp.sum(covar.astype(jnp.float32)))
    exp_covar = exp_covar.reshape(num_deg, 1)                    # [num_deg, 1]

    # Lane-dense layout: put N on the lane axis (wrapper-side layout plumbing).
    coords_t = coords2d.T                                        # [dim, N]

    # Lane tile: multiple of 128, clamped so tiny inputs don't over-pad.
    tile = max(128, (tile_lanes // 128) * 128)
    n_128 = pl.cdiv(n, 128) * 128
    tile = min(tile, n_128)
    n_pad = pl.cdiv(n, tile) * tile
    if n_pad != n:
        coords_t = jnp.pad(coords_t, ((0, 0), (0, n_pad - n)))   # tail-only pad

    kernel = functools.partial(_intepe_kernel, num_deg=num_deg, min_deg=min_deg)

    out_t = pl.pallas_call(
        kernel,
        out_shape=jax.ShapeDtypeStruct((out_dim, n_pad), jnp.float32),
        grid_spec=pltpu.PrefetchScalarGridSpec(
            num_scalar_prefetch=0,
            grid=(n_pad // tile,),
            in_specs=[
                pl.BlockSpec((dim, tile), lambda i: (0, i)),       # coords (lane tile)
                pl.BlockSpec((num_deg, 1), lambda i: (0, 0)),      # exp_covar (bcast)
            ],
            out_specs=pl.BlockSpec((out_dim, tile), lambda i: (0, i)),
        ),
        compiler_params=pltpu.CompilerParams(
            # Parallel grid axis -> both TensorCores get work on v7x.
            dimension_semantics=("parallel",),
            # ~5.5 MiB double-buffered at the default tile; comfortable on
            # v5e/v6e (128 MiB) and v7x (64 MiB physical / 32 MiB scoped).
            vmem_limit_bytes=32 * 1024 * 1024,
        ),
    )(coords_t, exp_covar)

    out = out_t[:, :n].T                                         # [N, 2*num_deg]
    return out.reshape(*lead_shape, out_dim)


def intepe_mixdim_reference(coords: jax.Array, covar: jax.Array,
                            min_deg: int, max_deg: int) -> jax.Array:
    """Pure-JAX reference mirroring the (de-bugged) PyTorch forward."""
    scales = jnp.arange(min_deg, max_deg, dtype=jnp.float32)     # [num_deg]
    encd = coords[..., 0:1] * scales[None, :]                    # == coords[...,0:1] @ scales[None,:]
    for i in range(1, coords.shape[-1]):
        encd = encd + coords[..., i:i + 1] * scales[None, :]
    exp_covar = jnp.exp(-0.5 * scales * jnp.sum(covar))          # [num_deg]
    return jnp.concatenate([jnp.sin(encd) * exp_covar,
                            jnp.cos(encd) * exp_covar], axis=-1)


if __name__ == "__main__":
    key = jax.random.PRNGKey(0)

    # Small shapes consistent with the module: coords [bsz, nsmpl, dim], covar [dim].
    bsz, nsmpl, dim = 2, 8, 3
    min_deg, max_deg = 0, 4

    k1, k2, k3 = jax.random.split(key, 3)
    coords = jax.random.normal(k1, (bsz, nsmpl, dim), dtype=jnp.float32)
    covar = jax.random.uniform(k2, (dim,), dtype=jnp.float32, minval=0.01, maxval=0.5)

    out = jax.block_until_ready(intepe_mixdim_forward(coords, covar, min_deg, max_deg))
    ref = intepe_mixdim_reference(coords, covar, min_deg, max_deg)
    assert out.shape == (bsz, nsmpl, 2 * (max_deg - min_deg)), out.shape
    assert jnp.allclose(out, ref, atol=1e-5, rtol=1e-5), "mismatch vs reference (3-D input)"

    # Also check the 2-D input convention [bsz, dim].
    coords2 = jax.random.normal(k3, (bsz, dim), dtype=jnp.float32)
    out2 = jax.block_until_ready(intepe_mixdim_forward(coords2, covar, min_deg, max_deg))
    ref2 = intepe_mixdim_reference(coords2, covar, min_deg, max_deg)
    assert out2.shape == (bsz, 2 * (max_deg - min_deg)), out2.shape
    assert jnp.allclose(out2, ref2, atol=1e-5, rtol=1e-5), "mismatch vs reference (2-D input)"

    print("KERNEL_OK")
</pallas_src>

<mosaic_0001>
module attributes {stable_mosaic.version = 11 : i64} {
  func.func @_intepe_kernel(%arg0: i32, %arg1: memref<3x128xf32, #tpu.memory_space<vmem>>, %arg2: memref<4x1xf32, #tpu.memory_space<vmem>>, %arg3: memref<8x128xf32, #tpu.memory_space<vmem>>) attributes {dimension_semantics = [#tpu.dimension_semantics<parallel>], iteration_bounds = array<i64: 1>, scalar_prefetch = 0 : i64, scratch_operands = 0 : i64, tpu.core_type = #tpu.core_type<tc>, window_params = [{transform_indices = @transform_0, window_bounds = array<i64: 3, 128>}, {pipeline_mode = #tpu.pipeline_mode<synchronous>, transform_indices = @transform_1, window_bounds = array<i64: 4, 1>}, {transform_indices = @transform_2, window_bounds = array<i64: 8, 128>}]} {
    %c0 = arith.constant 0 : index
    %c0_0 = arith.constant 0 : index
    %0 = vector.load %arg1[%c0, %c0_0] : memref<3x128xf32, #tpu.memory_space<vmem>>, vector<3x128xf32>
    %cst = arith.constant dense<0.000000e+00> : vector<128xf32>
    %1 = vector.multi_reduction <add>, %0, %cst [0] : vector<3x128xf32> to vector<128xf32>
    %2 = vector.shape_cast %1 : vector<128xf32> to vector<1x128xf32>
    %3 = tpu.iota {dimensions = array<i32: 0>} : vector<4x1xi32>
    %4 = arith.sitofp %3 : vector<4x1xi32> to vector<4x1xf32>
    %cst_1 = arith.constant 0.000000e+00 : f32
    %5 = vector.broadcast %cst_1 : f32 to vector<4x1xf32>
    %6 = arith.addf %4, %5 : vector<4x1xf32>
    %7 = vector.broadcast %6 : vector<4x1xf32> to vector<4x128xf32>
    %8 = vector.broadcast %2 : vector<1x128xf32> to vector<4x128xf32>
    %9 = arith.mulf %7, %8 : vector<4x128xf32>
    %c0_2 = arith.constant 0 : index
    %c0_3 = arith.constant 0 : index
    %10 = vector.load %arg2[%c0_2, %c0_3] : memref<4x1xf32, #tpu.memory_space<vmem>>, vector<4x1xf32>
    %11 = math.sin %9 : vector<4x128xf32>
    %12 = vector.broadcast %10 : vector<4x1xf32> to vector<4x128xf32>
    %13 = arith.mulf %11, %12 : vector<4x128xf32>
    %c0_4 = arith.constant 0 : index
    %c0_5 = arith.constant 0 : index
    %14 = vector.load %arg3[%c0_4, %c0_5] : memref<8x128xf32, #tpu.memory_space<vmem>>, vector<4x128xf32>
    tpu.vector_store %arg3[%c0_4, %c0_5], %13 {strides = array<i32>} : memref<8x128xf32, #tpu.memory_space<vmem>>, vector<4x128xf32>,
    %15 = math.cos %9 : vector<4x128xf32>
    %16 = vector.broadcast %10 : vector<4x1xf32> to vector<4x128xf32>
    %17 = arith.mulf %15, %16 : vector<4x128xf32>
    %c4 = arith.constant 4 : index
    %c0_6 = arith.constant 0 : index
    %18 = vector.load %arg3[%c4, %c0_6] : memref<8x128xf32, #tpu.memory_space<vmem>>, vector<4x128xf32>
    tpu.vector_store %arg3[%c4, %c0_6], %17 {strides = array<i32>} : memref<8x128xf32, #tpu.memory_space<vmem>>, vector<4x128xf32>,
    return
  }
  func.func @transform_0(%arg0: i32) -> (i32, i32) {
    %c0_i32 = arith.constant 0 : i32
    %c0_i32_0 = arith.constant 0 : i32
    return %c0_i32, %arg0 : i32, i32
  }
  func.func @transform_1(%arg0: i32) -> (i32, i32) {
    %c0_i32 = arith.constant 0 : i32
    %c0_i32_0 = arith.constant 0 : i32
    %c0_i32_1 = arith.constant 0 : i32
    return %c0_i32, %c0_i32_0 : i32, i32
  }
  func.func @transform_2(%arg0: i32) -> (i32, i32) {
    %c0_i32 = arith.constant 0 : i32
    %c0_i32_0 = arith.constant 0 : i32
    return %c0_i32, %arg0 : i32, i32
  }
}

</mosaic_0001>

<bundles_post_ra>
// kernel: tpu_custom_call.1
= control target key start
LH: loop header
LB: loop body
LE: loop exit
PB: predicated region body
PF: predicated region fallthrough
CT: control target
= control target key end

     0   :  { %vm13_vm0 = vcmask 1042432   ;;  %v304_v1 = vmov 0   ;;  %s357_s0 = inlined_call_operand.vmem [shape: f32[3,128], index: 0, kind: input, shape index: {}]   ;;  %s358_s1 = inlined_call_operand.vmem [shape: f32[4,1], index: 1, kind: input, shape index: {}]   ;;  %s359_s2 = inlined_call_operand.hbm [shape: f32[8,128], index: 2, kind: output, shape index: {}]  }
   0x1   :  { %v26_v0 = vld [vmem:[%s358_s1] sm:$0xf]  ;;  %277 = vset.pattern.permute.xlu0 %v304_v1 }
   0x2   :  { %133 = vperm.xlu0 %277, %v26_v0   ;;  %v12_v2 = vld [vmem:[%s357_s0] sm:$0x7] }
   0x3   :  { %v14_v3 = vsel %vm13_vm0, %v12_v2, 0.0 }
   0x4   :  { %7 = vsyncpa [#allocation3], 0  ;;  %v15_v4 = vrot.slane %v14_v3, 4  ;;  %v21_v5 = vlaneseq  ;;  %v305_v25 = vmov 683565275   ;;  %s311_s0 = smov [#allocation2]  }
   0x5   :  { %v306_v27 = vmov 2475754826   ;;  %v307_v29 = vmov 2131351028   ;;  %v308_v31 = vmov 2102212464  }
   0x6   :  { %v16_v6 = vadd.f32 %v15_v4, %v14_v3  ;;  %v22_v8 = vshrl.u32 %v21_v5, 7  ;;  %v309_v33 = vmov 920167782   ;;  %v310_v40 = vmov 1326507024   ;;  %s249_s1 = sshll.u32 %s311_s0, 4  ;;  %s250_s1 = int_to_ptr.vmem [resolvable:$true] %s249_s1 }
   0x7   :  { %s282_s13 = scalar_lea.vmem %s250_s1, 128  ;;  %p287_p1 = scmp.lt.s32.totalorder %s250_s1, %s250_s1 }
   0x8   :  { %v17_v7 = vrot.slane %v16_v6, 2  ;;  %v23_v11 = vcvt.s32.f32 %v22_v8  ;;  %p283_p0 = scmp.ne.s32.totalorder %s250_s1, %s282_s13  ;;  %p288_p2 = scmp.lt.s32.totalorder %s282_s13, %s282_s13 }
   0xa   :  { %v18_v9 = vadd.f32 %v17_v7, %v16_v6  ;;  %p289_p3 = por %p288_p2, %p287_p1 }
   0xc   :  { %v19_v10 = vrot.slane %v18_v9, 1  ;;  %p290_p4 = pnand %p289_p3, %p283_p0 }
   0xe   :  { %v20_v12 = vadd.f32 %v19_v10, %v18_v9 }
  0x10   :  { %v333_v13 = vmul.f32 %v23_v11, %v20_v12 }
  0x12   :  { %v30_v14 = vand.u32 2139095040, %v333_v13  ;;  %v27_v16 = vand.u32 2147483647, %v333_v13  ;;  %vm29_vm8 = vcmp.lt.s32.totalorder %v333_v13, 0  ;;  %vm119_vm0 = vweird.f32 %v333_v13 }
  0x14   :  { %v31_v15 = vshrl.u32 %v30_v14, 23  ;;  %v34_v19 = vand.u32 8388607, %v27_v16  ;;  %vm28_vm9 = vcmp.le.f32.partialorder %v27_v16, 0.7853982 }
  0x16   :  { %v257_v17 = vadd.s32 4294967169, %v31_v15  ;;  %v35_v22 = vor.u32 8388608, %v34_v19 }
  0x18   :  { %v37_v18 = vadd.s32 1, %v257_v17  ;;  %v75_v42 = vshll.u32 %v35_v22, 8 }
  0x1a   :  { %vm38_vm1 = vcmp.gt.s32.totalorder %v37_v18, 0 }
  0x1b   :  { %v39_v20 = vsel %vm38_vm1, %v37_v18, 0 }
  0x1c   :  { %v41_v21 = vand.u32 31, %v39_v20  ;;  %v40_v23 = vshrl.u32 %v39_v20, 5 }
  0x1e   :  { %v42_v24 = vsub.s32 32, %v41_v21  ;;  %v44_v26 = vshll.u32 %v305_v25, %v41_v21  ;;  %v47_v28 = vshll.u32 %v306_v27, %v41_v21  ;;  %v50_v30 = vshll.u32 %v307_v29, %v41_v21 }
  0x1f   :  { %v53_v32 = vshll.u32 %v308_v31, %v41_v21  ;;  %v56_v34 = vshll.u32 %v309_v33, %v41_v21  ;;  %vm59_vm2 = vcmp.lt.s32.totalorder %v40_v23, 1  ;;  %vm62_vm3 = vcmp.lt.s32.totalorder %v40_v23, 4 }
  0x20   :  { %v43_v35 = vshrl.u32 %v305_v25, %v42_v24  ;;  %v45_v36 = vshrl.u32 %v306_v27, %v42_v24  ;;  %v48_v37 = vshrl.u32 %v307_v29, %v42_v24  ;;  %v51_v38 = vshrl.u32 %v308_v31, %v42_v24 }
  0x21   :  { %v54_v39 = vshrl.u32 %v309_v33, %v42_v24  ;;  %v57_v41 = vshrl.u32 %v310_v40, %v42_v24  ;;  %vm60_vm4 = vcmp.lt.s32.totalorder %v40_v23, 2  ;;  %vm61_vm5 = vcmp.lt.s32.totalorder %v40_v23, 3 }
  0x22   :  { %v46_v43 = vor.u32 %v45_v36, %v44_v26  ;;  %v49_v44 = vor.u32 %v48_v37, %v47_v28  ;;  %v52_v45 = vor.u32 %v51_v38, %v50_v30 }
  0x23   :  { %v55_v46 = vor.u32 %v54_v39, %v53_v32  ;;  %v58_v47 = vor.u32 %v57_v41, %v56_v34 }
  0x24   :  { %v63_v48 = vsel %vm59_vm2, %v43_v35, %v46_v43  ;;  %v64_v49 = vsel %vm62_vm3, %v52_v45, 2102212464  ;;  %v67_v50 = vsel %vm59_vm2, %v46_v43, %v49_v44  ;;  %v71_v51 = vsel %vm59_vm2, %v49_v44, %v52_v45 }
  0x25   :  { %v65_v52 = vsel %vm61_vm5, %v49_v44, %v64_v49  ;;  %v68_v53 = vsel %vm62_vm3, %v55_v46, 920167782  ;;  %v72_v54 = vsel %vm62_vm3, %v58_v47, 1326507024 }
  0x26   :  { %v69_v55 = vsel %vm61_vm5, %v52_v45, %v68_v53  ;;  %v73_v56 = vsel %vm61_vm5, %v55_v46, %v72_v54  ;;  %v66_v57 = vsel %vm60_vm4, %v63_v48, %v65_v52 }
  0x27   :  { %v70_v58 = vsel %vm60_vm4, %v67_v50, %v69_v55  ;;  %v74_v59 = vsel %vm60_vm4, %v71_v51, %v73_v56  ;;  %v82_v0 = vmul.u32 %v75_v42, %v66_v57 }
  0x28   :  { %v339_v60 = vmul.u32.u64.low %v75_v42, %v74_v59  ;;  %v340_v61 = vmul.u32.u64.high %v75_v42, %v74_v59, %v339_v60  ;;  %v342_v62 = vmul.u32.u64.low %v75_v42, %v70_v58  ;;  %v343_v63 = vmul.u32.u64.high %v75_v42, %v70_v58, %v342_v62 }
  0x2a   :  { %vm84_vm6 = vc.u32 %v340_v61, %v342_v62  ;;  %v85_v1 = vadd.s32 1, %v343_v63  ;;  %v83_v12 = vadd.s32 %v342_v62, %v340_v61 }
  0x2c   :  { %v86_v2 = vsel %vm84_vm6, %v85_v1, %v343_v63 }
  0x2d   :  { %v87_v3 = vadd.s32 %v86_v2, %v82_v0 }
  0x2f   :  { %v88_v4 = vadd.s32 536870912, %v87_v3 }
  0x31   :  { %v89_v5 = vshrl.u32 %v88_v4, 30 }
  0x33   :  { %v90_v6 = vshll.u32 %v89_v5, 30  ;;  %v113_v30 = vsub.s32 4, %v89_v5 }
  0x35   :  { %v91_v7 = vsub.s32 %v87_v3, %v90_v6  ;;  %v114_v31 = vsel %vm29_vm8, %v113_v30, %v89_v5 }
  0x36   :  { %v116_v32 = vsel %vm28_vm9, 0, %v114_v31 }
  0x37   :  { %v93_v8 = vsub.s32 0, %v91_v7  ;;  %v120_v33 = vadd.s32 3, %v116_v32  ;;  %v231_v37 = vand.u32 3, %v116_v32 }
  0x39   :  { %v258_v9 = vmin.u32 %v93_v8, %v91_v7  ;;  %v121_v36 = vand.u32 3, %v120_v33  ;;  %vm233_vm12 = vcmp.eq.s32.totalorder %v231_v37, 0  ;;  %vm236_vm13 = vcmp.eq.s32.totalorder %v231_v37, 2 }
  0x3a   :  { %vm232_vm15 = vcmp.lt.s32.totalorder %v231_v37, 2 }
  0x3b   :  { %v95_v10 = vclz %v258_v9  ;;  %vm123_vm10 = vcmp.eq.s32.totalorder %v121_v36, 0  ;;  %vm126_vm11 = vcmp.eq.s32.totalorder %v121_v36, 2  ;;  %vm122_vm14 = vcmp.lt.s32.totalorder %v121_v36, 2 }
  0x3d   :  { %v259_v11 = vadd.s32 4294967294, %v95_v10 }
  0x3f   :  { %vm260_vm7 = vcmp.lt.s32.totalorder %v259_v11, 0 }
  0x40   :  { %v98_v14 = vsel %vm260_vm7, 0, %v259_v11 }
  0x41   :  { %v99_v15 = vsub.s32 32, %v98_v14  ;;  %v103_v17 = vsub.s32 4294967266, %v98_v14  ;;  %v100_v19 = vshll.u32 %v91_v7, %v98_v14 }
  0x43   :  { %v104_v18 = vadd.s32 127, %v103_v17  ;;  %v101_v20 = vshrl.u32 %v83_v12, %v99_v15 }
  0x45   :  { %v105_v21 = vshll.u32 %v104_v18, 23  ;;  %v102_v22 = vor.u32 %v101_v20, %v100_v19 }
  0x47   :  { %v106_v23 = vor.u32 4788187, %v105_v21  ;;  %v109_v25 = vcvt.s32.f32 %v102_v22 }
  0x49   :  { %v107_v24 = vand.u32 2147483647, %v106_v23 }
  0x4b   :  { %v110_v26 = vmul.f32 %v109_v25, %v107_v24 }
  0x4d   :  { %v111_v27 = vxor.u32 2147483648, %v110_v26 }
  0x4f   :  { %v112_v28 = vsel %vm29_vm8, %v111_v27, %v110_v26 }
  0x50   :  { %v115_v29 = vsel %vm28_vm9, %v333_v13, %v112_v28 }
  0x51   :  { %278 = vcosq.f32 %v115_v29 }
  0x52   :  { %280 = vsinq.f32 %v115_v29 }
  0x5e   :  { %v279_v34 = vpop.eup %278 }
  0x5f   :  { %v281_v35 = vpop.eup %280  ;;  %v127_v39 = vxor.u32 2147483648, %v279_v34 }
  0x60   :  { %v124_v38 = vxor.u32 2147483648, %v281_v35 }
  0x61   :  { %v128_v40 = vsel %vm126_vm11, %v127_v39, %v281_v35  ;;  %v238_v42 = vsel %vm236_vm13, %v127_v39, %v281_v35 }
  0x62   :  { %v125_v16 = vsel %vm123_vm10, %v279_v34, %v124_v38  ;;  %v235_v41 = vsel %vm233_vm12, %v279_v34, %v124_v38 }
  0x63   :  { %v129_v43 = vsel %vm122_vm14, %v125_v16, %v128_v40  ;;  %v239_v44 = vsel %vm232_vm15, %v235_v41, %v238_v42 }
  0x64   :  { %v130_v45 = vsel %vm119_vm0, nan, %v129_v43  ;;  %v240_v46 = vsel %vm119_vm0, nan, %v239_v44 }
  0x7d   :  { %v134_v47 = vpop.permute.xlu0 %133 }
  0x7e   :  { %v136_v48 = vmul.f32 %v134_v47, %v130_v45  ;;  %v241_v49 = vmul.f32 %v240_v46, %v134_v47 }
  0x80   :  { %137 = vst [vmem:[#allocation2] sm:$0xf] %v136_v48  ;;  %242 = vst [vmem:[#allocation2 + $0x4] sm:$0xf] %v241_v49 }
  0x81   :  { %293 = shalt.err (!%p290_p4)
}
  0x82   :  { %252 = dma.vmem_to_hbm [thread:$0]  %s250_s1, 128, %s359_s2, [#allocation3]  }
  0x83   :  { %302 = dma.done.wait [#allocation3], 128  }
  0x84   :  { %303 = vsyncadd [#allocation3], 4294967168 }
  0x85   :  { %256 = vsyncpa [#allocation3], 1 }

</bundles_post_ra>
